<compile_context>
chip_gen: v7x
topology: tpu7x:2x2x1
jax: 0.10.0
libtpu: 0.0.40
codegen_flags: <defaults>
</compile_context>

<pallas_src>
import jax
import jax.numpy as jnp
from jax.experimental import pallas as pl
from jax.experimental.pallas import tpu as pltpu


def _attention_kernel(hidp_ref, enc_ref, w2t_ref, v_ref, out_ref):
    # hidp_ref: (TB, H)     f32  precomputed  hid_sum @ W1^T + b   (hoisted to wrapper)
    # enc_ref : (S, TB, H)  bf16 encoder outputs in their NATIVE (src, batch, hid) layout
    # w2t_ref : (H, H)      bf16 encoder half of the attn weight, transposed (resident)
    # v_ref   : (1, H)      f32  v weight, no bias (resident)
    # out_ref : (TB, S)     f32  softmax attention weights, lane-dense on src_len
    s, tb, h = enc_ref.shape

    # energy_pre = enc @ W2^T : one (S*TB, H) x (H, H) MXU matmul on the flattened
    # slab.  The flatten is layout-free because TB is padded (in the wrapper) to the
    # sublane-packing multiple of the compute dtype (8 rows f32 / 16 rows bf16).
    pre = jnp.dot(
        enc_ref[...].reshape(s * tb, h), w2t_ref[...],
        preferred_element_type=jnp.float32,
    ).reshape(s, tb, h)                                             # (S, TB, H) f32

    # energy = relu(enc@W2^T + (hid@W1^T + b)); hidden path broadcast over src_len.
    # Post-matmul elementwise stays f32 (v5e VPU has no bf16 lanes).
    energy = jnp.maximum(pre + hidp_ref[...][None, :, :], 0.0)      # (S, TB, H) f32

    # scores = energy @ v^T as broadcast-multiply + lane reduce over H -> (S, TB);
    # one small XLU transpose makes it (TB, S) so the softmax reductions and the
    # output store are lane-dense on src_len.
    scores = jnp.sum(energy * v_ref[...], axis=-1)                  # (S, TB) f32
    scores = scores.T                                               # (TB, S)

    # softmax over src_len; whole S lives in this block so plain max/exp/sum is exact.
    m = jnp.max(scores, axis=-1, keepdims=True)                     # (TB, 1)
    e = jnp.exp(scores - m)                                         # (TB, S)
    d = jnp.sum(e, axis=-1, keepdims=True)                          # (TB, 1)
    # Exact divide (NOT approx reciprocal): downstream code consumes these as
    # normalized weights, and the divisor is only a (TB, 1) tile -> negligible cost.
    out_ref[...] = (e / d).astype(out_ref.dtype)


def _vmem_budgets():
    """(per-step block budget, vmem_limit cap) sized per TPU generation."""
    try:
        cap = int(getattr(pltpu.get_tpu_info(), "vmem_capacity_bytes", 64 << 20))
    except Exception:
        cap = 64 << 20                      # unknown backend: assume smallest (v7x)
    if cap <= (64 << 20):                   # v7x-class: 64 MiB VMEM -> stay well under
        return 24 << 20, 40 << 20
    return 48 << 20, 80 << 20               # v5e / v6e: 128 MiB VMEM


def _block_footprint_bytes(tb, S, H, in_bytes):
    enc_blk = 2 * S * tb * H * in_bytes     # double-buffered encoder stream
    hid_blk = 2 * tb * H * 4                # double-buffered hidden projection
    out_blk = 2 * tb * S * 4                # double-buffered output tile
    interm = 2 * S * tb * H * 4             # f32 pre/energy intermediates
    resident = H * H * in_bytes + H * 4     # resident W2^T and v
    return enc_blk + hid_blk + out_blk + interm + resident


def _pick_batch_block(B_pad, S, H, in_bytes, budget_bytes, mult, target_rows=2048):
    """Largest batch block (multiple of `mult`, divides B_pad) whose double-buffered
    footprint fits the budget; prefer >= 2 grid steps (v7x megacore) and >= target_rows
    MXU rows per step."""
    divs = [d for d in range(mult, B_pad + 1, mult) if B_pad % d == 0]
    fits = [d for d in divs if _block_footprint_bytes(d, S, H, in_bytes) <= budget_bytes]
    if not fits:
        return divs[0]                                  # smallest legal block
    multi = [d for d in fits if B_pad // d >= 2]        # keep both TCs busy on v7x
    pool = multi if multi else fits
    big = [d for d in pool if d * S >= target_rows]
    return big[0] if big else pool[-1]


def attention_forward(hidden, encoder_outputs, attn_w, attn_b, v_w,
                      compute_dtype=jnp.bfloat16):
    """hidden: (L, B, H); encoder_outputs: (S, B, H) -> (B, S) softmax weights."""
    L, B, H = hidden.shape
    S = encoder_outputs.shape[0]
    f32 = jnp.float32
    cdt = jnp.dtype(compute_dtype)
    in_bytes = cdt.itemsize

    # ---- wrapper glue (pure JAX; all tiny except the enc dtype cast, which is a
    # no-op once the encoder already produces bf16) ----
    hid_sum = jnp.sum(hidden.astype(f32), axis=0)                       # (B, H)
    w1t = attn_w[:, :H].astype(f32).T                                   # (H, H)
    w2t = attn_w[:, H:].astype(cdt).T                                   # (H, H) -> MXU
    hid_proj = hid_sum @ w1t + attn_b.astype(f32)                       # (B, H) hoisted
    v = v_w.reshape(1, H).astype(f32)                                   # (1, H)
    enc = encoder_outputs.astype(cdt)                                   # (S, B, H) native layout

    # Pad batch so each block's second-minor dim matches the sublane packing of the
    # compute dtype (8 for f32, 16 for bf16); keeps the in-kernel flatten layout-free
    # and handles odd batch sizes without a single oversized block.
    pad_mult = 8 * max(1, 4 // in_bytes)
    B_pad = -(-B // pad_mult) * pad_mult
    if B_pad != B:
        enc = jnp.pad(enc, ((0, 0), (0, B_pad - B), (0, 0)))
        hid_proj = jnp.pad(hid_proj, ((0, B_pad - B), (0, 0)))

    budget, limit_cap = _vmem_budgets()
    tb = _pick_batch_block(B_pad, S, H, in_bytes, budget, pad_mult)
    grid = (B_pad // tb,)
    vmem_limit = int(min(max(2 * _block_footprint_bytes(tb, S, H, in_bytes) + (2 << 20),
                             16 << 20), limit_cap))

    cost = pl.CostEstimate(
        flops=int(2 * B_pad * S * H * H + 5 * B_pad * S * H + 5 * B_pad * S),
        transcendentals=int(B_pad * S),
        bytes_accessed=int(S * B_pad * H * in_bytes + B_pad * H * 4
                           + H * H * in_bytes + H * 4 + B_pad * S * 4),
    )

    out = pl.pallas_call(
        _attention_kernel,
        out_shape=jax.ShapeDtypeStruct((B_pad, S), f32),
        grid=grid,
        in_specs=[
            pl.BlockSpec((tb, H), lambda i: (i, 0)),        # hid_proj (2-D, no size-1 dim)
            pl.BlockSpec((S, tb, H), lambda i: (0, i, 0)),  # encoder outputs, native layout
            pl.BlockSpec((H, H), lambda i: (0, 0)),         # W2^T (resident)
            pl.BlockSpec((1, H), lambda i: (0, 0)),         # v    (resident)
        ],
        out_specs=pl.BlockSpec((tb, S), lambda i: (i, 0)),  # lane-dense on src_len
        compiler_params=pltpu.CompilerParams(
            dimension_semantics=("parallel",),
            vmem_limit_bytes=vmem_limit,
        ),
        cost_estimate=cost,
    )(hid_proj, enc, w2t, v)

    return out[:B]                                                       # (B, S)


def _reference(hidden, encoder_outputs, attn_w, attn_b, v_w):
    # pure-JAX f32 mirror of the PyTorch forward
    h = jnp.sum(hidden, axis=0)                              # (B, H)
    S = encoder_outputs.shape[0]
    h = jnp.repeat(h[:, None, :], S, axis=1)                 # (B, S, H)
    enc = jnp.transpose(encoder_outputs, (1, 0, 2))          # (B, S, H)
    cat = jnp.concatenate([h, enc], axis=2)                  # (B, S, 2H)
    energy = jax.nn.relu(cat @ attn_w.T + attn_b)            # (B, S, H)
    attention = (energy @ v_w.T)[..., 0]                     # (B, S)
    return jax.nn.softmax(attention, axis=1)


if __name__ == "__main__":
    num_layers, batch, src_len, hid_dim = 2, 2, 8, 32

    key = jax.random.PRNGKey(0)
    k1, k2, k3, k4, k5 = jax.random.split(key, 5)

    hidden = jax.random.normal(k1, (num_layers, batch, hid_dim), dtype=jnp.float32)
    encoder_outputs = jax.random.normal(k2, (src_len, batch, hid_dim), dtype=jnp.float32)

    # "Linear" parameters: attn: Linear(2H -> H), v: Linear(H -> 1, bias=False)
    attn_w = 0.1 * jax.random.normal(k3, (hid_dim, 2 * hid_dim), dtype=jnp.float32)
    attn_b = 0.1 * jax.random.normal(k4, (hid_dim,), dtype=jnp.float32)
    v_w = 0.1 * jax.random.normal(k5, (1, hid_dim), dtype=jnp.float32)

    out = attention_forward(hidden, encoder_outputs, attn_w, attn_b, v_w)
    out = jax.block_until_ready(out)

    ref = _reference(hidden, encoder_outputs, attn_w, attn_b, v_w)
    assert out.shape == (batch, src_len)
    # tolerance accounts only for the bf16 encoder/weight stream feeding the MXU
    # (f32 accumulation); the softmax normalization itself is exact.
    assert jnp.allclose(out, ref, atol=1e-2, rtol=1e-2), "mismatch vs reference"
    assert jnp.allclose(jnp.sum(out, axis=1), 1.0, atol=1e-4), "softmax rows must sum to 1"

    print("KERNEL_OK")
</pallas_src>

<mosaic_0001>
module attributes {stable_mosaic.version = 11 : i64} {
  func.func @_attention_kernel(%arg0: i32, %arg1: memref<16x32xf32, #tpu.memory_space<vmem>>, %arg2: memref<8x16x32xbf16, #tpu.memory_space<vmem>>, %arg3: memref<32x32xbf16, #tpu.memory_space<vmem>>, %arg4: memref<1x32xf32, #tpu.memory_space<vmem>>, %arg5: memref<16x8xf32, #tpu.memory_space<vmem>>) attributes {dimension_semantics = [#tpu.dimension_semantics<parallel>], iteration_bounds = array<i64: 1>, scalar_prefetch = 0 : i64, scratch_operands = 0 : i64, tpu.core_type = #tpu.core_type<tc>, window_params = [{transform_indices = @transform_0, window_bounds = array<i64: 16, 32>}, {transform_indices = @transform_1, window_bounds = array<i64: 8, 16, 32>}, {pipeline_mode = #tpu.pipeline_mode<synchronous>, transform_indices = @transform_2, window_bounds = array<i64: 32, 32>}, {pipeline_mode = #tpu.pipeline_mode<synchronous>, transform_indices = @transform_3, window_bounds = array<i64: 1, 32>}, {transform_indices = @transform_4, window_bounds = array<i64: 16, 8>}]} {
    %c0 = arith.constant 0 : index
    %c0_0 = arith.constant 0 : index
    %c0_1 = arith.constant 0 : index
    %0 = vector.load %arg2[%c0, %c0_0, %c0_1] : memref<8x16x32xbf16, #tpu.memory_space<vmem>>, vector<8x16x32xbf16>
    %1 = vector.shape_cast %0 : vector<8x16x32xbf16> to vector<128x32xbf16>
    %c0_2 = arith.constant 0 : index
    %c0_3 = arith.constant 0 : index
    %2 = vector.load %arg3[%c0_2, %c0_3] : memref<32x32xbf16, #tpu.memory_space<vmem>>, vector<32x32xbf16>
    %cst = arith.constant dense<0.000000e+00> : vector<128x32xf32>
    %3 = tpu.matmul %1, %2, %cst {dimension_numbers = #tpu.dot_dimension_numbers<[1], [0], [0], [1], [0, 0, 1, 1], [], []>} : vector<128x32xbf16>, vector<32x32xbf16>, vector<128x32xf32> -> vector<128x32xf32>
    %4 = vector.shape_cast %3 : vector<128x32xf32> to vector<8x16x32xf32>
    %c0_4 = arith.constant 0 : index
    %c0_5 = arith.constant 0 : index
    %5 = vector.load %arg1[%c0_4, %c0_5] : memref<16x32xf32, #tpu.memory_space<vmem>>, vector<16x32xf32>
    %6 = vector.shape_cast %5 : vector<16x32xf32> to vector<1x16x32xf32>
    %7 = vector.broadcast %6 : vector<1x16x32xf32> to vector<8x16x32xf32>
    %8 = arith.addf %4, %7 : vector<8x16x32xf32>
    %cst_6 = arith.constant 0.000000e+00 : f32
    %9 = vector.broadcast %cst_6 : f32 to vector<8x16x32xf32>
    %10 = arith.maximumf %8, %9 : vector<8x16x32xf32>
    %c0_7 = arith.constant 0 : index
    %c0_8 = arith.constant 0 : index
    %11 = vector.load %arg4[%c0_7, %c0_8] : memref<1x32xf32, #tpu.memory_space<vmem>>, vector<1x32xf32>
    %12 = vector.shape_cast %11 : vector<1x32xf32> to vector<1x1x32xf32>
    %13 = vector.broadcast %12 : vector<1x1x32xf32> to vector<8x16x32xf32>
    %14 = arith.mulf %10, %13 : vector<8x16x32xf32>
    %cst_9 = arith.constant dense<0.000000e+00> : vector<8x16xf32>
    %15 = vector.multi_reduction <add>, %14, %cst_9 [2] : vector<8x16x32xf32> to vector<8x16xf32>
    %16 = tpu.transpose %15, [1, 0] : vector<8x16xf32> -> vector<16x8xf32>
    %cst_10 = arith.constant dense<0xFF800000> : vector<16xf32>
    %17 = vector.multi_reduction <maximumf>, %16, %cst_10 [1] : vector<16x8xf32> to vector<16xf32>
    %18 = vector.shape_cast %17 : vector<16xf32> to vector<16x1xf32>
    %19 = vector.broadcast %18 : vector<16x1xf32> to vector<16x8xf32>
    %20 = arith.subf %16, %19 : vector<16x8xf32>
    %21 = math.exp %20 : vector<16x8xf32>
    %cst_11 = arith.constant dense<0.000000e+00> : vector<16xf32>
    %22 = vector.multi_reduction <add>, %21, %cst_11 [1] : vector<16x8xf32> to vector<16xf32>
    %23 = vector.shape_cast %22 : vector<16xf32> to vector<16x1xf32>
    %24 = vector.broadcast %23 : vector<16x1xf32> to vector<16x8xf32>
    %25 = arith.divf %21, %24 : vector<16x8xf32>
    %c0_12 = arith.constant 0 : index
    %c0_13 = arith.constant 0 : index
    %26 = vector.load %arg5[%c0_12, %c0_13] : memref<16x8xf32, #tpu.memory_space<vmem>>, vector<16x8xf32>
    tpu.vector_store %arg5[%c0_12, %c0_13], %25 {strides = array<i32>} : memref<16x8xf32, #tpu.memory_space<vmem>>, vector<16x8xf32>,
    return
  }
  func.func @transform_0(%arg0: i32) -> (i32, i32) {
    %c0_i32 = arith.constant 0 : i32
    %c0_i32_0 = arith.constant 0 : i32
    return %arg0, %c0_i32 : i32, i32
  }
  func.func @transform_1(%arg0: i32) -> (i32, i32, i32) {
    %c0_i32 = arith.constant 0 : i32
    %c0_i32_0 = arith.constant 0 : i32
    %c0_i32_1 = arith.constant 0 : i32
    return %c0_i32, %arg0, %c0_i32_0 : i32, i32, i32
  }
  func.func @transform_2(%arg0: i32) -> (i32, i32) {
    %c0_i32 = arith.constant 0 : i32
    %c0_i32_0 = arith.constant 0 : i32
    %c0_i32_1 = arith.constant 0 : i32
    return %c0_i32, %c0_i32_0 : i32, i32
  }
  func.func @transform_3(%arg0: i32) -> (i32, i32) {
    %c0_i32 = arith.constant 0 : i32
    %c0_i32_0 = arith.constant 0 : i32
    %c0_i32_1 = arith.constant 0 : i32
    return %c0_i32, %c0_i32_0 : i32, i32
  }
  func.func @transform_4(%arg0: i32) -> (i32, i32) {
    %c0_i32 = arith.constant 0 : i32
    %c0_i32_0 = arith.constant 0 : i32
    return %arg0, %c0_i32 : i32, i32
  }
}

</mosaic_0001>

<bundles_post_ra>
// kernel: tpu_custom_call.1
= control target key start
LH: loop header
LB: loop body
LE: loop exit
PB: predicated region body
PF: predicated region fallthrough
CT: control target
= control target key end

     0   :  { %9 = vsyncpa [#allocation3], 0  ;;  %s837_s0 = inlined_call_operand.hbm [shape: f32[16,32], index: 0, kind: input, shape index: {}]   ;;  %s838_s1 = inlined_call_operand.hbm [shape: bf16[8,16,32], index: 1, kind: input, shape index: {}]   ;;  %s839_s2 = inlined_call_operand.hbm [shape: bf16[32,32], index: 2, kind: input, shape index: {}]   ;;  %s840_s3 = inlined_call_operand.vmem [shape: f32[1,32], index: 3, kind: input, shape index: {}]   ;;  %s841_s4 = inlined_call_operand.vmem [shape: f32[16,8], index: 4, kind: output, shape index: {}]  }
   0x1   :  { %10 = vsyncpa [#allocation5], 0  ;;  %s677_s15 = smov [#allocation4]   ;;  %s607_s19 = scalar_lea.hbm %s838_s1, 1024 }
   0x2   :  { %s28_s16 = sshll.u32 %s677_s15, 4  ;;  %p608_p0 = scmp.ne.s32.totalorder %s838_s1, %s607_s19  ;;  %s29_s16 = int_to_ptr.vmem [resolvable:$true] %s28_s16 }
   0x3   :  { %p611_p1 = scmp.lt.u32.totalorder %s607_s19, %s838_s1 }
   0x5   :  { %p613_p2 = pnand %p611_p1, %p608_p0 }
   0x7   :  { %616 = shalt.err (!%p613_p2)
}
   0x8   :  { %s617_s24 = scalar_lea.vmem %s29_s16, 1024  ;;  %p622_p4 = scmp.lt.s32.totalorder %s29_s16, %s29_s16 }
   0x9   :  { %p618_p3 = scmp.ne.s32.totalorder %s29_s16, %s617_s24  ;;  %p623_p5 = scmp.lt.s32.totalorder %s617_s24, %s617_s24 }
   0xb   :  { %p624_p6 = por %p623_p5, %p622_p4 }
   0xd   :  { %p625_p7 = pnand %p624_p6, %p618_p3 }
   0xf   :  { %628 = shalt.err (!%p625_p7)
}
  0x10   :  { %s678_s25 = smov 64   ;;  %s679_s26 = smov 4  }
  0x11   :  { %34 = dma.hbm_to_vmem [thread:$0]  %s838_s1, 1024, %s29_s16, [#allocation5], %s678_s25, %s678_s25, %s679_s26  }
  0x12   :  { %s680_s29 = smov [#allocation2]   ;;  %s629_s7 = scalar_lea.hbm %s837_s0, 256 }
  0x13   :  { %s16_s30 = sshll.u32 %s680_s29, 4  ;;  %p630_p8 = scmp.ne.s32.totalorder %s837_s0, %s629_s7  ;;  %s17_s30 = int_to_ptr.vmem [resolvable:$true] %s16_s30 }
  0x14   :  { %p633_p9 = scmp.lt.u32.totalorder %s629_s7, %s837_s0 }
  0x16   :  { %p635_p10 = pnand %p633_p9, %p630_p8 }
  0x18   :  { %638 = shalt.err (!%p635_p10)
}
  0x19   :  { %s639_s12 = scalar_lea.vmem %s17_s30, 256  ;;  %p644_p12 = scmp.lt.s32.totalorder %s17_s30, %s17_s30 }
  0x1a   :  { %p640_p11 = scmp.ne.s32.totalorder %s17_s30, %s639_s12  ;;  %p645_p13 = scmp.lt.s32.totalorder %s639_s12, %s639_s12 }
  0x1c   :  { %p646_p0 = por %p645_p13, %p644_p12 }
  0x1e   :  { %p647_p1 = pnand %p646_p0, %p640_p11 }
  0x20   :  { %650 = shalt.err (!%p647_p1)
}
  0x21   :  { %s681_s1 = smov 128   ;;  %s682_s13 = smov 8  }
  0x22   :  { %22 = dma.hbm_to_vmem [thread:$0]  %s837_s0, 256, %s17_s30, [#allocation3], %s681_s1, %s681_s1, %s682_s13  }
  0x23   :  { %s683_s16 = smov [#allocation6]   ;;  %s651_s20 = scalar_lea.hbm %s839_s2, 256 }
  0x24   :  { %s40_s17 = sshll.u32 %s683_s16, 4  ;;  %p652_p2 = scmp.ne.s32.totalorder %s839_s2, %s651_s20  ;;  %s41_s17 = int_to_ptr.vmem [resolvable:$true] %s40_s17 }
  0x25   :  { %p655_p3 = scmp.lt.u32.totalorder %s651_s20, %s839_s2 }
  0x27   :  { %p657_p4 = pnand %p655_p3, %p652_p2 }
  0x29   :  { %660 = shalt.err (!%p657_p4)
}
  0x2a   :  { %s661_s27 = scalar_lea.vmem %s41_s17, 256  ;;  %p666_p6 = scmp.lt.s32.totalorder %s41_s17, %s41_s17 }
  0x2b   :  { %p662_p5 = scmp.ne.s32.totalorder %s41_s17, %s661_s27  ;;  %p667_p7 = scmp.lt.s32.totalorder %s661_s27, %s661_s27 }
  0x2d   :  { %p668_p8 = por %p667_p7, %p666_p6 }
  0x2f   :  { %p669_p9 = pnand %p668_p8, %p662_p5 }
  0x31   :  { %672 = shalt.err (!%p669_p9)
}
  0x32   :  { %46 = dma.hbm_to_vmem [thread:$0]  %s839_s2, 256, %s41_s17, [#allocation5], %s678_s25, %s678_s25, %s679_s26  }
  0x33   :  { %673 = dma.done.wait [#allocation3], 256  }
  0x34   :  { %674 = vsyncadd [#allocation3], 4294967040 }
  0x35   :  { %675 = dma.done.wait [#allocation5], 1280  }
  0x36   :  { %676 = vsyncadd [#allocation5], 4294966016  ;;  %v589_v0 = vld [vmem:[#allocation6] sm:$0xff]   ;;  %v590_v1 = vld [vmem:[#allocation6 + $0x8] sm:$0xff]   ;;  %vm131_vm0 = vcmask 261120   ;;  %vm385_vm1 = vcmask 130112  }
  0x37   :  { %557 = vmatprep.subr.bf16.mxu0 %v589_v0  ;;  %577 = vmatprep.subr.bf16.mxu1 %v589_v0  ;;  %v591_v2 = vld [vmem:[#allocation4] sm:$0xff]   ;;  %v593_v4 = vld [vmem:[#allocation4 + $0x8] sm:$0xff]   ;;  %v595_v6 = vld [vmem:[#allocation4 + $0x10] sm:$0xff]   ;;  %vm450_vm2 = vcmask 1041409   ;;  %vm452_vm3 = vcmask 1042434   ;;  %vm454_vm4 = vcmask 1043459  }
  0x38   :  { %558 = vmatpush3.bf16.msra.mxu0 %v589_v0  ;;  %579 = vmatpush3.bf16.msra.mxu1 %v589_v0  ;;  %v592_v3 = vld [vmem:[#allocation4 + $0x20] sm:$0xff]   ;;  %v594_v5 = vld [vmem:[#allocation4 + $0x28] sm:$0xff]   ;;  %v597_v7 = vld [vmem:[#allocation4 + $0x30] sm:$0xff]   ;;  %vm456_vm5 = vcmask 1044484   ;;  %vm458_vm6 = vcmask 1045509   ;;  %vm460_vm7 = vcmask 1046534  }
  0x39   :  { %559 = vmatprep.subr.bf16.mxu0 %v590_v1  ;;  %578 = vmatprep.subr.bf16.mxu1 %v590_v1  ;;  %v596_v8 = vld [vmem:[#allocation4 + $0x18] sm:$0xff]   ;;  %v759_v10 = vld [vmem:[#allocation2] sm:$0xff]  ;;  %v770_v22 = vld [vmem:[%s840_s3] ss:$0 sm:$0xff]  ;;  %vm462_vm8 = vcmask 1047559   ;;  %vm497_vm9 = vcmask 64512  }
  0x3a   :  { %561 = vmatprep.mubr.msk.bf16.mxu0 %vm131_vm0, %v591_v2  ;;  %569 = vmatprep.mubr.msk.bf16.mxu1 %vm131_vm0, %v592_v3  ;;  %v598_v9 = vld [vmem:[#allocation4 + $0x38] sm:$0xff]  }
  0x3b   :  { %v761_v13 = vld [vmem:[#allocation2 + $0x8] sm:$0xff] }
  0x3c   :  { %560 = vmatpush3.bf16.msra.mxu0 %v590_v1  ;;  %580 = vmatpush3.bf16.msra.mxu1 %v590_v1 }
  0x3f   :  { %562 = vmatmul.mubr.msk.bf16.vlgmr.msra.gmra.mrb[0].mxu0 %vm131_vm0, %v593_v4  ;;  %570 = vmatmul.mubr.msk.bf16.vlgmr.msra.gmra.mrb[0].mxu1 %vm131_vm0, %v594_v5 }
  0x40   :  { %565 = vmatprep.mubr.msk.bf16.mxu0 %vm131_vm0, %v595_v6  ;;  %573 = vmatprep.mubr.msk.bf16.mxu1 %vm131_vm0, %v597_v7 }
  0x47   :  { %566 = vmatmul.mubr.msk.bf16.gmra.mrb[4].mxu0 %vm131_vm0, %v596_v8  ;;  %574 = vmatmul.mubr.msk.bf16.gmra.mrb[4].mxu1 %vm131_vm0, %v598_v9 }
 0x112   :  { %v563_v11 = vpop.f32.mrb[0].mxu0  ;;  %v571_v12 = vpop.f32.mrb[0].mxu1 }
 0x113   :  { %v257_v14 = vadd.f32 %v563_v11, %v759_v10  ;;  %v265_v15 = vadd.f32 %v571_v12, %v759_v10  ;;  %v190_v16 = vpop.f32.mrb[1].mxu0  ;;  %v222_v17 = vpop.f32.mrb[1].mxu1 }
 0x114   :  { %v255_v18 = vadd.f32 %v759_v10, %v190_v16  ;;  %v263_v19 = vadd.f32 %v759_v10, %v222_v17  ;;  %v564_v20 = vpop.f32.mrb[2].mxu0  ;;  %v572_v21 = vpop.f32.mrb[2].mxu1 }
 0x115   :  { %v273_v23 = vmax.f32 %v257_v14, 0.0  ;;  %v281_v24 = vmax.f32 %v265_v15, 0.0  ;;  %v258_v25 = vadd.f32 %v564_v20, %v761_v13  ;;  %v266_v26 = vadd.f32 %v572_v21, %v761_v13  ;;  %v193_v27 = vpop.f32.mrb[3].mxu0  ;;  %v225_v28 = vpop.f32.mrb[3].mxu1 }
 0x116   :  { %v271_v29 = vmax.f32 %v255_v18, 0.0  ;;  %v279_v33 = vmax.f32 %v263_v19, 0.0  ;;  %v256_v35 = vadd.f32 %v761_v13, %v193_v27  ;;  %v264_v36 = vadd.f32 %v761_v13, %v225_v28 }
 0x117   :  { %v274_v30 = vmax.f32 %v258_v25, 0.0  ;;  %v304_v31 = vmul.f32 %v770_v22, %v281_v24  ;;  %v296_v32 = vmul.f32 %v770_v22, %v273_v23  ;;  %v282_v34 = vmax.f32 %v266_v26, 0.0 }
 0x118   :  { %v294_v39 = vmul.f32 %v770_v22, %v271_v29  ;;  %v272_v45 = vmax.f32 %v256_v35, 0.0  ;;  %v280_v46 = vmax.f32 %v264_v36, 0.0  ;;  %v302_v48 = vmul.f32 %v770_v22, %v279_v33 }
 0x119   :  { %v340_v37 = vsel %vm131_vm0, %v304_v31, 0.0  ;;  %v316_v38 = vsel %vm131_vm0, %v296_v32, 0.0  ;;  %v297_v40 = vmul.f32 %v770_v22, %v274_v30  ;;  %v305_v49 = vmul.f32 %v770_v22, %v282_v34 }
 0x11a   :  { %341 = vadd.xlane.f32.xlu0 %v340_v37  ;;  %317 = vadd.xlane.f32.xlu1 %v316_v38  ;;  %v567_v41 = vpop.f32.mrb[4].mxu0  ;;  %v575_v42 = vpop.f32.mrb[4].mxu1  ;;  %v310_v52 = vsel %vm131_vm0, %v294_v39, 0.0  ;;  %v334_v57 = vsel %vm131_vm0, %v302_v48, 0.0  ;;  %v303_v59 = vmul.f32 %v770_v22, %v280_v46  ;;  %v295_v60 = vmul.f32 %v770_v22, %v272_v45 }
 0x11b   :  { %v206_v43 = vpop.f32.mrb[5].mxu0  ;;  %v238_v44 = vpop.f32.mrb[5].mxu1  ;;  %v261_v51 = vadd.f32 %v567_v41, %v759_v10  ;;  %v319_v53 = vsel %vm131_vm0, %v297_v40, 0.0  ;;  %v343_v58 = vsel %vm131_vm0, %v305_v49, 0.0  ;;  %v269_v9 = vadd.f32 %v575_v42, %v759_v10 }
 0x11c   :  { %v568_v47 = vpop.f32.mrb[6].mxu0  ;;  %v576_v50 = vpop.f32.mrb[6].mxu1  ;;  %v259_v62 = vadd.f32 %v759_v10, %v206_v43  ;;  %v267_v1 = vadd.f32 %v759_v10, %v238_v44  ;;  %v337_v2 = vsel %vm131_vm0, %v303_v59, 0.0  ;;  %v313_v3 = vsel %vm131_vm0, %v295_v60, 0.0 }
 0x11d   :  { %v262_v54 = vadd.f32 %v568_v47, %v761_v13  ;;  %v209_v55 = vpop.f32.mrb[7].mxu0  ;;  %v241_v56 = vpop.f32.mrb[7].mxu1  ;;  %v277_v61 = vmax.f32 %v261_v51, 0.0  ;;  %v270_v12 = vadd.f32 %v576_v50, %v761_v13  ;;  %v285_v19 = vmax.f32 %v269_v9, 0.0 }
 0x11e   :  { %311 = vadd.xlane.f32.xlu0 %v310_v52  ;;  %320 = vadd.xlane.f32.xlu1 %v319_v53  ;;  %v260_v0 = vadd.f32 %v761_v13, %v209_v55  ;;  %v268_v4 = vadd.f32 %v761_v13, %v241_v56  ;;  %v275_v5 = vmax.f32 %v259_v62, 0.0  ;;  %v283_v11 = vmax.f32 %v267_v1, 0.0 }
 0x11f   :  { %v278_v63 = vmax.f32 %v262_v54, 0.0  ;;  %v300_v7 = vmul.f32 %v770_v22, %v277_v61  ;;  %v286_v20 = vmax.f32 %v270_v12, 0.0  ;;  %v308_v26 = vmul.f32 %v770_v22, %v285_v19 }
 0x120   :  { %v276_v6 = vmax.f32 %v260_v0, 0.0  ;;  %v284_v14 = vmax.f32 %v268_v4, 0.0  ;;  %v298_v17 = vmul.f32 %v770_v22, %v275_v5  ;;  %v306_v23 = vmul.f32 %v770_v22, %v283_v11 }
 0x121   :  { %v301_v8 = vmul.f32 %v770_v22, %v278_v63  ;;  %v328_v15 = vsel %vm131_vm0, %v300_v7, 0.0  ;;  %v309_v27 = vmul.f32 %v770_v22, %v286_v20  ;;  %v352_v28 = vsel %vm131_vm0, %v308_v26, 0.0 }
 0x122   :  { %335 = vadd.xlane.f32.xlu0 %v334_v57  ;;  %344 = vadd.xlane.f32.xlu1 %v343_v58  ;;  %v299_v18 = vmul.f32 %v770_v22, %v276_v6  ;;  %v322_v21 = vsel %vm131_vm0, %v298_v17, 0.0  ;;  %v307_v13 = vmul.f32 %v770_v22, %v284_v14  ;;  %v346_v24 = vsel %vm131_vm0, %v306_v23, 0.0 }
 0x123   :  { %v331_v16 = vsel %vm131_vm0, %v301_v8, 0.0  ;;  %v355_v29 = vsel %vm131_vm0, %v309_v27, 0.0  ;;  %v374_v32 = vlaneseq }
 0x124   :  { %v325_v10 = vsel %vm131_vm0, %v299_v18, 0.0  ;;  %v349_v25 = vsel %vm131_vm0, %v307_v13, 0.0 }
 0x125   :  { %v375_v35 = vand.u32 127, %v374_v32  ;;  %v377_v39 = vshrl.u32 %v374_v32, 7 }
 0x126   :  { %338 = vadd.xlane.f32.xlu1 %v337_v2  ;;  %314 = vadd.xlane.f32.xlu0 %v313_v3 }
 0x127   :  { %v380_v38 = vadd.s32 4294967288, %v375_v35  ;;  %v378_v42 = vsub.s32 %v375_v35, %v377_v39 }
 0x129   :  { %v383_v41 = vsub.s32 %v380_v38, %v377_v39 }
 0x12a   :  { %329 = vadd.xlane.f32.xlu0 %v328_v15  ;;  %332 = vadd.xlane.f32.xlu1 %v331_v16 }
 0x12e   :  { %323 = vadd.xlane.f32.xlu0 %v322_v21  ;;  %326 = vadd.xlane.f32.xlu1 %v325_v10 }
 0x132   :  { %347 = vadd.xlane.f32.xlu0 %v346_v24  ;;  %350 = vadd.xlane.f32.xlu1 %v349_v25 }
 0x136   :  { %353 = vadd.xlane.f32.xlu0 %v352_v28  ;;  %356 = vadd.xlane.f32.xlu1 %v355_v29 }
 0x1a7   :  { %v342_v30 = vpop.xlane.xlu0 %341  ;;  %v318_v31 = vpop.xlane.xlu1 %317 }
 0x1a8   :  { %v390_v48 = vrot.slane %v318_v31, %v378_v42  ;;  %v426_v62 = vrot.slane %v342_v30, %v378_v42 }
 0x1ab   :  { %v312_v33 = vpop.xlane.xlu0 %311  ;;  %v321_v34 = vpop.xlane.xlu1 %320 }
 0x1ac   :  { %v379_v46 = vrot.slane %v312_v33, %v378_v42  ;;  %v394_v47 = vrot.slane %v321_v34, %v383_v41 }
 0x1ae   :  { %v395_v57 = vsel %vm385_vm1, %v394_v47, %v390_v48 }
 0x1af   :  { %v336_v36 = vpop.xlane.xlu0 %335  ;;  %v345_v37 = vpop.xlane.xlu1 %344 }
 0x1b0   :  { %v417_v58 = vrot.slane %v336_v36, %v378_v42  ;;  %v430_v59 = vrot.slane %v345_v37, %v383_v41 }
 0x1b2   :  { %v431_v8 = vsel %vm385_vm1, %v430_v59, %v426_v62 }
 0x1b3   :  { %v339_v40 = vpop.xlane.xlu1 %338  ;;  %v315_v22 = vpop.xlane.xlu0 %314 }
 0x1b4   :  { %v384_v43 = vrot.slane %v315_v22, %v383_v41  ;;  %v421_v54 = vrot.slane %v339_v40, %v383_v41 }
 0x1b6   :  { %v386_v49 = vsel %vm385_vm1, %v384_v43, %v379_v46  ;;  %v422_v3 = vsel %vm385_vm1, %v421_v54, %v417_v58 }
 0x1b7   :  { %v330_v44 = vpop.xlane.xlu0 %329  ;;  %v333_v45 = vpop.xlane.xlu1 %332  ;;  %v451_v60 = vsel %vm450_vm2, %v395_v57, %v386_v49 }
 0x1b8   :  { %v408_v50 = vrot.slane %v330_v44, %v378_v42  ;;  %v412_v51 = vrot.slane %v333_v45, %v383_v41 }
 0x1ba   :  { %v413_v63 = vsel %vm385_vm1, %v412_v51, %v408_v50 }
 0x1bb   :  { %v324_v52 = vpop.xlane.xlu0 %323  ;;  %v327_v53 = vpop.xlane.xlu1 %326 }
 0x1bc   :  { %v399_v55 = vrot.slane %v324_v52, %v378_v42  ;;  %v403_v56 = vrot.slane %v327_v53, %v383_v41 }
 0x1be   :  { %v404_v61 = vsel %vm385_vm1, %v403_v56, %v399_v55 }
 0x1bf   :  { %v453_v0 = vsel %vm452_vm3, %v404_v61, %v451_v60  ;;  %v348_v1 = vpop.xlane.xlu0 %347  ;;  %v351_v2 = vpop.xlane.xlu1 %350 }
 0x1c0   :  { %v435_v4 = vrot.slane %v348_v1, %v378_v42  ;;  %v439_v5 = vrot.slane %v351_v2, %v383_v41  ;;  %v455_v6 = vsel %vm454_vm4, %v413_v63, %v453_v0 }
 0x1c1   :  { %v457_v7 = vsel %vm456_vm5, %v422_v3, %v455_v6 }
 0x1c2   :  { %v440_v12 = vsel %vm385_vm1, %v439_v5, %v435_v4  ;;  %v459_v14 = vsel %vm458_vm6, %v431_v8, %v457_v7 }
 0x1c3   :  { %v354_v9 = vpop.xlane.xlu0 %353  ;;  %v357_v11 = vpop.xlane.xlu1 %356  ;;  %v461_v18 = vsel %vm460_vm7, %v440_v12, %v459_v14 }
 0x1c4   :  { %v444_v15 = vrot.slane %v354_v9, %v378_v42  ;;  %v448_v16 = vrot.slane %v357_v11, %v383_v41 }
 0x1c6   :  { %v449_v17 = vsel %vm385_vm1, %v448_v16, %v444_v15 }
 0x1c7   :  { %v463_v19 = vsel %vm462_vm8, %v449_v17, %v461_v18 }
 0x1c8   :  { %465 = vxpose.xlu0.b32.start.end [1/1] (short) (narrow) %v463_v19, 16 }
 0x248   :  { %v481_v20 = vpop.trf.xlu0 }
 0x249   :  { %v498_v21 = vsel %vm497_vm9, %v481_v20, -inf }
 0x24a   :  { %499 = vmax.xlane.f32.xlu1 %v498_v21 }
 0x24c   :  { %v482_v10 = vpop.trf.xlu0 }
 0x24d   :  { %v501_v23 = vsel %vm497_vm9, %v482_v10, -inf }
 0x24e   :  { %502 = vmax.xlane.f32.xlu1 %v501_v23 }
 0x2d7   :  { %v500_v13 = vpop.xlane.xlu1 %499 }
 0x2d8   :  { %v504_v24 = vsub.f32 %v481_v20, %v500_v13 }
 0x2da   :  { %v506_v25 = vmul.f32 1.442695, %v504_v24 }
 0x2db   :  { %v503_v26 = vpop.xlane.xlu1 %502 }
 0x2dc   :  { %599 = vpow2.f32 %v506_v25  ;;  %v505_v27 = vsub.f32 %v482_v10, %v503_v26 }
 0x2de   :  { %v508_v28 = vmul.f32 1.442695, %v505_v27 }
 0x2e0   :  { %601 = vpow2.f32 %v508_v28 }
 0x2e6   :  { %v600_v29 = vpop.eup %599 }
 0x2e7   :  { %v510_v30 = vsel %vm497_vm9, %v600_v29, 0.0 }
 0x2e8   :  { %511 = vadd.xlane.f32.xlu1 %v510_v30 }
 0x2ea   :  { %v602_v31 = vpop.eup %601 }
 0x2eb   :  { %v513_v32 = vsel %vm497_vm9, %v602_v31, 0.0 }
 0x2ec   :  { %514 = vadd.xlane.f32.xlu1 %v513_v32 }
 0x375   :  { %v512_v33 = vpop.xlane.xlu1 %511 }
 0x376   :  { %603 = vrcp.f32 %v512_v33 }
 0x379   :  { %v515_v34 = vpop.xlane.xlu1 %514 }
 0x37a   :  { %605 = vrcp.f32 %v515_v34 }
 0x380   :  { %v604_v35 = vpop.eup %603 }
 0x381   :  { %v517_v36 = vmul.f32 %v604_v35, %v600_v29 }
 0x383   :  { %520 = vst.msk [vmem:[%s841_s4] sm:$0xff] %vm497_vm9, %v517_v36 }
 0x384   :  { %v606_v37 = vpop.eup %605 }
 0x385   :  { %v519_v38 = vmul.f32 %v606_v37, %v602_v31 }
 0x387   :  { %521 = vst.msk [vmem:[%s841_s4 + $0x8] sm:$0xff] %vm497_vm9, %v519_v38 }
 0x388   :  { %526 = vsyncpa [#allocation3], 1 }
 0x389   :  { %527 = vsyncpa [#allocation5], 1 }

</bundles_post_ra>
